<compile_context>
chip_gen: v6e
topology: v6e:2x2x1
jax: 0.10.0
libtpu: 0.0.40
codegen_flags: <defaults>
</compile_context>

<pallas_src>
import math

import jax
import jax.numpy as jnp
from jax.experimental import pallas as pl
from jax.experimental.pallas import tpu as pltpu

# ---- module hyper-parameters (consistent with the torch module) ----
N_HEADS = 4
D_MODEL = 32
D_K = D_MODEL // N_HEADS
SCALED = True
NEG_INF = -1000000000.0               # exact masked_fill value used by torch

ROWS_PER_STEP = 512                   # tunable rows-per-grid-step target
VMEM_STEP_BUDGET = 24 * 1024 * 1024   # double-buffered working-set cap (v7x-safe)


def mha_kernel(x_ref, mask_ref, wqkv_ref, bqkv_ref, wo_ref, bo_ref, o_ref, ctx_ref):
    rows = x_ref.shape[0]              # Bt * S rows in this block (static)
    bt, s, _ = mask_ref.shape          # static block shape

    x = x_ref[...]                                                        # (rows, D)
    # Fused (and pre-scaled) Q|K|V projection: one (rows,32)x(32,96) MXU matmul.
    qkv = jnp.dot(x, wqkv_ref[...],
                  preferred_element_type=jnp.float32) + bqkv_ref[...]     # (rows, 3D)

    # Hoisted mask predicate; used for exact torch masked_fill semantics below.
    keep = mask_ref[...] != 0                                             # (Bt, S, S)

    for h in range(N_HEADS):           # static, fully unrolled head loop
        lo = h * D_K
        qh = qkv[:, lo:lo + D_K].reshape(bt, s, D_K)
        kh = qkv[:, D_MODEL + lo:D_MODEL + lo + D_K].reshape(bt, s, D_K)
        vh = qkv[:, 2 * D_MODEL + lo:2 * D_MODEL + lo + D_K].reshape(bt, s, D_K)

        # scale already folded into the Q columns of wqkv (wrapper-side)
        att = jnp.einsum('bqd,bkd->bqk', qh, kh,
                         preferred_element_type=jnp.float32)              # (Bt, S, S)
        att = jnp.where(keep, att, NEG_INF)       # == torch masked_fill(m == 0, -1e9)

        # numerically-stable softmax; EUP reciprocal + multiply instead of a divide
        att = att - jnp.max(att, axis=-1, keepdims=True)
        p = jnp.exp(att)
        p = p * pl.reciprocal(jnp.sum(p, axis=-1, keepdims=True), approx=True)

        oh = jnp.einsum('bqk,bkd->bqd', p, vh,
                        preferred_element_type=jnp.float32)               # (Bt, S, D_K)
        # Assemble head outputs at their lane offset in a VMEM scratch:
        # no value-level lane concat and no per-head Wo dot.
        ctx_ref[:, lo:lo + D_K] = oh.reshape(rows, D_K)

    # Single fused output projection: one (rows,32)x(32,32) MXU matmul + bias.
    o_ref[...] = (jnp.dot(ctx_ref[...], wo_ref[...],
                          preferred_element_type=jnp.float32)
                  + bo_ref[...]).astype(o_ref.dtype)


def multi_head_attention(x, m, params, rows_per_step=ROWS_PER_STEP):
    B, S, D = x.shape
    assert D == D_MODEL and D_MODEL % N_HEADS == 0
    assert S % 8 == 0, "S must be a multiple of 8 to satisfy (8,128) block tiling"
    wq, bq, wk, bk, wv, bv, wo, bo = params

    # Fold the attention scale into the Q projection (tiny one-time wrapper op).
    scale = (1.0 / math.sqrt(D_K)) if SCALED else 1.0
    wqkv = jnp.concatenate([wq * scale, wk, wv], axis=1)      # (D, 3D)
    bqkv = jnp.concatenate([bq * scale, bk, bv], axis=1)      # (1, 3D)
    # NOTE: casting x/wqkv/wo to bf16 would halve HBM traffic on all generations;
    # kept f32 to preserve the torch module's eval-mode numerics.

    # bf16 {0,1} mask: halves the O(B*S^2) mask HBM stream; zero-ness is preserved
    # exactly, so masked_fill semantics are unchanged.
    mask = (m != 0).astype(jnp.bfloat16)                      # (B, S, S)

    # ---- batch-tile selection -------------------------------------------------
    bt = min(B, max(1, rows_per_step // S))
    while B % bt:
        bt -= 1
    if B >= 2:                      # keep >= 2 "parallel" grid steps (v7x megacore)
        bt = min(bt, B // 2)
        while B % bt:
            bt -= 1

    def step_bytes(btv):            # double-buffered per-step working set
        r = btv * S
        return 2 * (r * D * x.dtype.itemsize        # x block
                    + btv * S * S * 2               # bf16 mask block
                    + r * D * x.dtype.itemsize)     # output block

    while bt > 1 and step_bytes(bt) > VMEM_STEP_BUDGET:   # v7x has only 64 MiB VMEM
        bt -= 1
        while B % bt:
            bt -= 1

    nb = B // bt
    rows = bt * S

    x2 = x.reshape(B * S, D)        # free: identical HBM bytes, row-major

    out = pl.pallas_call(
        mha_kernel,
        out_shape=jax.ShapeDtypeStruct((B * S, D), x.dtype),
        grid=(nb,),
        in_specs=[
            pl.BlockSpec((rows, D), lambda i: (i, 0)),       # x rows of this block
            pl.BlockSpec((bt, S, S), lambda i: (i, 0, 0)),   # bf16 mask
            pl.BlockSpec((D, 3 * D), lambda i: (0, 0)),      # fused (pre-scaled) Wqkv
            pl.BlockSpec((1, 3 * D), lambda i: (0, 0)),      # fused bqkv
            pl.BlockSpec((D, D), lambda i: (0, 0)),          # Wo
            pl.BlockSpec((1, D), lambda i: (0, 0)),          # bo
        ],
        out_specs=pl.BlockSpec((rows, D), lambda i: (i, 0)),
        scratch_shapes=[pltpu.VMEM((rows, D_MODEL), jnp.float32)],  # head-assembly ctx
        compiler_params=pltpu.CompilerParams(
            dimension_semantics=("parallel",),
            vmem_limit_bytes=32 * 1024 * 1024),   # v5e scoped default is only 16 MiB
    )(x2, mask, wqkv, bqkv, wo, bo)

    return out.reshape(B, S, D)


def init_params(key, d_model):
    # Deterministic init mimicking nn.Linear default (uniform +/- 1/sqrt(fan_in)).
    bound = 1.0 / math.sqrt(d_model)
    keys = jax.random.split(key, 8)

    def u(k, shape):
        return jax.random.uniform(k, shape, jnp.float32, -bound, bound)

    wq, wk, wv, wo = (u(keys[i], (d_model, d_model)) for i in range(4))
    bq, bk, bv, bo = (u(keys[4 + i], (1, d_model)) for i in range(4))
    return (wq, bq, wk, bk, wv, bv, wo, bo)


def reference_mha(x, m, params):
    # Pure-JAX reference mirroring the torch forward (eval mode).
    wq, bq, wk, bk, wv, bv, wo, bo = params
    B, S, D = x.shape
    q = x @ wq + bq
    k = x @ wk + bk
    v = x @ wv + bv

    def split(t):
        return t.reshape(B, S, N_HEADS, D_K).transpose(0, 2, 1, 3)  # (B, H, S, d_k)

    q, k, v = split(q), split(k), split(v)
    att = jnp.einsum("bhqd,bhkd->bhqk", q, k)
    if SCALED:
        att = att / math.sqrt(D_K)
    att = jnp.where(m[:, None, :, :] == 0, NEG_INF, att)
    att = jax.nn.softmax(att, axis=-1)
    out = jnp.einsum("bhqk,bhkd->bhqd", att, v)
    out = out.transpose(0, 2, 1, 3).reshape(B, S, D)
    return out @ wo + bo


if __name__ == "__main__":
    B, S = 2, 8
    key = jax.random.PRNGKey(0)
    k_x, k_p = jax.random.split(key)

    x = jax.random.normal(k_x, (B, S, D_MODEL), jnp.float32)
    # causal-style mask, 0 => masked position (no fully-masked rows)
    m = jnp.tril(jnp.ones((S, S), jnp.float32))
    m = jnp.broadcast_to(m, (B, S, S))

    params = init_params(k_p, D_MODEL)

    out = multi_head_attention(x, m, params)
    jax.block_until_ready(out)

    ref = reference_mha(x, m, params)
    assert out.shape == (B, S, D_MODEL)
    # tolerance loosened slightly to accommodate the approx (EUP) reciprocal
    assert jnp.allclose(out, ref, atol=2e-3, rtol=2e-3), "mismatch vs JAX reference"

    print("KERNEL_OK")
</pallas_src>

<mosaic_0001>
module attributes {stable_mosaic.version = 11 : i64} {
  func.func @mha_kernel(%arg0: i32, %arg1: memref<8x32xf32, #tpu.memory_space<vmem>>, %arg2: memref<1x8x8xbf16, #tpu.memory_space<vmem>>, %arg3: memref<32x96xf32, #tpu.memory_space<vmem>>, %arg4: memref<1x96xf32, #tpu.memory_space<vmem>>, %arg5: memref<32x32xf32, #tpu.memory_space<vmem>>, %arg6: memref<1x32xf32, #tpu.memory_space<vmem>>, %arg7: memref<8x32xf32, #tpu.memory_space<vmem>>, %arg8: memref<8x32xf32, #tpu.memory_space<vmem>>) attributes {dimension_semantics = [#tpu.dimension_semantics<parallel>], iteration_bounds = array<i64: 2>, scalar_prefetch = 0 : i64, scratch_operands = 1 : i64, tpu.core_type = #tpu.core_type<tc>, window_params = [{transform_indices = @transform_0, window_bounds = array<i64: 8, 32>}, {transform_indices = @transform_1, window_bounds = array<i64: 1, 8, 8>}, {pipeline_mode = #tpu.pipeline_mode<synchronous>, transform_indices = @transform_2, window_bounds = array<i64: 32, 96>}, {pipeline_mode = #tpu.pipeline_mode<synchronous>, transform_indices = @transform_3, window_bounds = array<i64: 1, 96>}, {pipeline_mode = #tpu.pipeline_mode<synchronous>, transform_indices = @transform_4, window_bounds = array<i64: 32, 32>}, {pipeline_mode = #tpu.pipeline_mode<synchronous>, transform_indices = @transform_5, window_bounds = array<i64: 1, 32>}, {transform_indices = @transform_6, window_bounds = array<i64: 8, 32>}]} {
    %c0 = arith.constant 0 : index
    %c0_0 = arith.constant 0 : index
    %0 = vector.load %arg1[%c0, %c0_0] : memref<8x32xf32, #tpu.memory_space<vmem>>, vector<8x32xf32>
    %c0_1 = arith.constant 0 : index
    %c0_2 = arith.constant 0 : index
    %1 = vector.load %arg3[%c0_1, %c0_2] : memref<32x96xf32, #tpu.memory_space<vmem>>, vector<32x96xf32>
    %cst = arith.constant dense<0.000000e+00> : vector<8x96xf32>
    %2 = tpu.matmul %0, %1, %cst {dimension_numbers = #tpu.dot_dimension_numbers<[1], [0], [0], [1], [0, 0, 1, 1], [], []>} : vector<8x32xf32>, vector<32x96xf32>, vector<8x96xf32> -> vector<8x96xf32>
    %c0_3 = arith.constant 0 : index
    %c0_4 = arith.constant 0 : index
    %3 = vector.load %arg4[%c0_3, %c0_4] : memref<1x96xf32, #tpu.memory_space<vmem>>, vector<1x96xf32>
    %4 = vector.broadcast %3 : vector<1x96xf32> to vector<8x96xf32>
    %5 = arith.addf %2, %4 : vector<8x96xf32>
    %c0_5 = arith.constant 0 : index
    %c0_6 = arith.constant 0 : index
    %c0_7 = arith.constant 0 : index
    %6 = vector.load %arg2[%c0_5, %c0_6, %c0_7] : memref<1x8x8xbf16, #tpu.memory_space<vmem>>, vector<1x8x8xbf16>
    %cst_8 = arith.constant 0.000000e+00 : bf16
    %7 = vector.broadcast %cst_8 : bf16 to vector<1x8x8xbf16>
    %8 = arith.cmpf one, %6, %7 : vector<1x8x8xbf16>
    %9 = vector.extract_strided_slice %5 {offsets = [0, 0], sizes = [8, 8], strides = [1, 1]} : vector<8x96xf32> to vector<8x8xf32>
    %10 = vector.shape_cast %9 : vector<8x8xf32> to vector<1x8x8xf32>
    %11 = vector.extract_strided_slice %5 {offsets = [0, 32], sizes = [8, 8], strides = [1, 1]} : vector<8x96xf32> to vector<8x8xf32>
    %12 = vector.shape_cast %11 : vector<8x8xf32> to vector<1x8x8xf32>
    %13 = vector.extract_strided_slice %5 {offsets = [0, 64], sizes = [8, 8], strides = [1, 1]} : vector<8x96xf32> to vector<8x8xf32>
    %14 = vector.shape_cast %13 : vector<8x8xf32> to vector<1x8x8xf32>
    "tpu.trace_start"() <{level = 10 : i32, message = "bqd,bkd->bqk"}> : () -> ()
    %cst_9 = arith.constant dense<0.000000e+00> : vector<1x8x8xf32>
    %15 = tpu.matmul %10, %12, %cst_9 {dimension_numbers = #tpu.dot_dimension_numbers<[2], [2], [1], [1], [0, 0, 0, 1, 1, 1], [0], [0]>} : vector<1x8x8xf32>, vector<1x8x8xf32>, vector<1x8x8xf32> -> vector<1x8x8xf32>
    %cst_10 = arith.constant -1.000000e+09 : f32
    "tpu.trace_stop"() : () -> ()
    %16 = vector.broadcast %cst_10 : f32 to vector<1x8x8xf32>
    %17 = arith.select %8, %15, %16 : vector<1x8x8xi1>, vector<1x8x8xf32>
    %cst_11 = arith.constant dense<0xFF800000> : vector<1x8xf32>
    %18 = vector.multi_reduction <maximumf>, %17, %cst_11 [2] : vector<1x8x8xf32> to vector<1x8xf32>
    %19 = vector.shape_cast %18 : vector<1x8xf32> to vector<1x8x1xf32>
    %20 = vector.broadcast %19 : vector<1x8x1xf32> to vector<1x8x8xf32>
    %21 = arith.subf %17, %20 : vector<1x8x8xf32>
    %22 = math.exp %21 : vector<1x8x8xf32>
    %cst_12 = arith.constant dense<0.000000e+00> : vector<1x8xf32>
    %23 = vector.multi_reduction <add>, %22, %cst_12 [2] : vector<1x8x8xf32> to vector<1x8xf32>
    %24 = vector.shape_cast %23 : vector<1x8xf32> to vector<1x8x1xf32>
    %25 = tpu.reciprocal %24 {approx = true} : vector<1x8x1xf32> -> vector<1x8x1xf32>
    %26 = vector.broadcast %25 : vector<1x8x1xf32> to vector<1x8x8xf32>
    %27 = arith.mulf %22, %26 : vector<1x8x8xf32>
    "tpu.trace_start"() <{level = 10 : i32, message = "bqk,bkd->bqd"}> : () -> ()
    %cst_13 = arith.constant dense<0.000000e+00> : vector<1x8x8xf32>
    %28 = tpu.matmul %27, %14, %cst_13 {dimension_numbers = #tpu.dot_dimension_numbers<[2], [1], [1], [2], [0, 0, 0, 1, 1, 2], [0], [0]>} : vector<1x8x8xf32>, vector<1x8x8xf32>, vector<1x8x8xf32> -> vector<1x8x8xf32>
    "tpu.trace_stop"() : () -> ()
    %29 = vector.shape_cast %28 : vector<1x8x8xf32> to vector<8x8xf32>
    %c0_14 = arith.constant 0 : index
    %c0_15 = arith.constant 0 : index
    %30 = vector.load %arg8[%c0_14, %c0_15] : memref<8x32xf32, #tpu.memory_space<vmem>>, vector<8x8xf32>
    tpu.vector_store %arg8[%c0_14, %c0_15], %29 {strides = array<i32>} : memref<8x32xf32, #tpu.memory_space<vmem>>, vector<8x8xf32>,
    %31 = vector.extract_strided_slice %5 {offsets = [0, 8], sizes = [8, 8], strides = [1, 1]} : vector<8x96xf32> to vector<8x8xf32>
    %32 = vector.shape_cast %31 : vector<8x8xf32> to vector<1x8x8xf32>
    %33 = vector.extract_strided_slice %5 {offsets = [0, 40], sizes = [8, 8], strides = [1, 1]} : vector<8x96xf32> to vector<8x8xf32>
    %34 = vector.shape_cast %33 : vector<8x8xf32> to vector<1x8x8xf32>
    %35 = vector.extract_strided_slice %5 {offsets = [0, 72], sizes = [8, 8], strides = [1, 1]} : vector<8x96xf32> to vector<8x8xf32>
    %36 = vector.shape_cast %35 : vector<8x8xf32> to vector<1x8x8xf32>
    "tpu.trace_start"() <{level = 10 : i32, message = "bqd,bkd->bqk"}> : () -> ()
    %cst_16 = arith.constant dense<0.000000e+00> : vector<1x8x8xf32>
    %37 = tpu.matmul %32, %34, %cst_16 {dimension_numbers = #tpu.dot_dimension_numbers<[2], [2], [1], [1], [0, 0, 0, 1, 1, 1], [0], [0]>} : vector<1x8x8xf32>, vector<1x8x8xf32>, vector<1x8x8xf32> -> vector<1x8x8xf32>
    %cst_17 = arith.constant -1.000000e+09 : f32
    "tpu.trace_stop"() : () -> ()
    %38 = vector.broadcast %cst_17 : f32 to vector<1x8x8xf32>
    %39 = arith.select %8, %37, %38 : vector<1x8x8xi1>, vector<1x8x8xf32>
    %cst_18 = arith.constant dense<0xFF800000> : vector<1x8xf32>
    %40 = vector.multi_reduction <maximumf>, %39, %cst_18 [2] : vector<1x8x8xf32> to vector<1x8xf32>
    %41 = vector.shape_cast %40 : vector<1x8xf32> to vector<1x8x1xf32>
    %42 = vector.broadcast %41 : vector<1x8x1xf32> to vector<1x8x8xf32>
    %43 = arith.subf %39, %42 : vector<1x8x8xf32>
    %44 = math.exp %43 : vector<1x8x8xf32>
    %cst_19 = arith.constant dense<0.000000e+00> : vector<1x8xf32>
    %45 = vector.multi_reduction <add>, %44, %cst_19 [2] : vector<1x8x8xf32> to vector<1x8xf32>
    %46 = vector.shape_cast %45 : vector<1x8xf32> to vector<1x8x1xf32>
    %47 = tpu.reciprocal %46 {approx = true} : vector<1x8x1xf32> -> vector<1x8x1xf32>
    %48 = vector.broadcast %47 : vector<1x8x1xf32> to vector<1x8x8xf32>
    %49 = arith.mulf %44, %48 : vector<1x8x8xf32>
    "tpu.trace_start"() <{level = 10 : i32, message = "bqk,bkd->bqd"}> : () -> ()
    %cst_20 = arith.constant dense<0.000000e+00> : vector<1x8x8xf32>
    %50 = tpu.matmul %49, %36, %cst_20 {dimension_numbers = #tpu.dot_dimension_numbers<[2], [1], [1], [2], [0, 0, 0, 1, 1, 2], [0], [0]>} : vector<1x8x8xf32>, vector<1x8x8xf32>, vector<1x8x8xf32> -> vector<1x8x8xf32>
    "tpu.trace_stop"() : () -> ()
    %51 = vector.shape_cast %50 : vector<1x8x8xf32> to vector<8x8xf32>
    %c0_21 = arith.constant 0 : index
    %c8 = arith.constant 8 : index
    %52 = vector.load %arg8[%c0_21, %c8] : memref<8x32xf32, #tpu.memory_space<vmem>>, vector<8x8xf32>
    tpu.vector_store %arg8[%c0_21, %c8], %51 {strides = array<i32>} : memref<8x32xf32, #tpu.memory_space<vmem>>, vector<8x8xf32>,
    %53 = vector.extract_strided_slice %5 {offsets = [0, 16], sizes = [8, 8], strides = [1, 1]} : vector<8x96xf32> to vector<8x8xf32>
    %54 = vector.shape_cast %53 : vector<8x8xf32> to vector<1x8x8xf32>
    %55 = vector.extract_strided_slice %5 {offsets = [0, 48], sizes = [8, 8], strides = [1, 1]} : vector<8x96xf32> to vector<8x8xf32>
    %56 = vector.shape_cast %55 : vector<8x8xf32> to vector<1x8x8xf32>
    %57 = vector.extract_strided_slice %5 {offsets = [0, 80], sizes = [8, 8], strides = [1, 1]} : vector<8x96xf32> to vector<8x8xf32>
    %58 = vector.shape_cast %57 : vector<8x8xf32> to vector<1x8x8xf32>
    "tpu.trace_start"() <{level = 10 : i32, message = "bqd,bkd->bqk"}> : () -> ()
    %cst_22 = arith.constant dense<0.000000e+00> : vector<1x8x8xf32>
    %59 = tpu.matmul %54, %56, %cst_22 {dimension_numbers = #tpu.dot_dimension_numbers<[2], [2], [1], [1], [0, 0, 0, 1, 1, 1], [0], [0]>} : vector<1x8x8xf32>, vector<1x8x8xf32>, vector<1x8x8xf32> -> vector<1x8x8xf32>
    %cst_23 = arith.constant -1.000000e+09 : f32
    "tpu.trace_stop"() : () -> ()
    %60 = vector.broadcast %cst_23 : f32 to vector<1x8x8xf32>
    %61 = arith.select %8, %59, %60 : vector<1x8x8xi1>, vector<1x8x8xf32>
    %cst_24 = arith.constant dense<0xFF800000> : vector<1x8xf32>
    %62 = vector.multi_reduction <maximumf>, %61, %cst_24 [2] : vector<1x8x8xf32> to vector<1x8xf32>
    %63 = vector.shape_cast %62 : vector<1x8xf32> to vector<1x8x1xf32>
    %64 = vector.broadcast %63 : vector<1x8x1xf32> to vector<1x8x8xf32>
    %65 = arith.subf %61, %64 : vector<1x8x8xf32>
    %66 = math.exp %65 : vector<1x8x8xf32>
    %cst_25 = arith.constant dense<0.000000e+00> : vector<1x8xf32>
    %67 = vector.multi_reduction <add>, %66, %cst_25 [2] : vector<1x8x8xf32> to vector<1x8xf32>
    %68 = vector.shape_cast %67 : vector<1x8xf32> to vector<1x8x1xf32>
    %69 = tpu.reciprocal %68 {approx = true} : vector<1x8x1xf32> -> vector<1x8x1xf32>
    %70 = vector.broadcast %69 : vector<1x8x1xf32> to vector<1x8x8xf32>
    %71 = arith.mulf %66, %70 : vector<1x8x8xf32>
    "tpu.trace_start"() <{level = 10 : i32, message = "bqk,bkd->bqd"}> : () -> ()
    %cst_26 = arith.constant dense<0.000000e+00> : vector<1x8x8xf32>
    %72 = tpu.matmul %71, %58, %cst_26 {dimension_numbers = #tpu.dot_dimension_numbers<[2], [1], [1], [2], [0, 0, 0, 1, 1, 2], [0], [0]>} : vector<1x8x8xf32>, vector<1x8x8xf32>, vector<1x8x8xf32> -> vector<1x8x8xf32>
    "tpu.trace_stop"() : () -> ()
    %73 = vector.shape_cast %72 : vector<1x8x8xf32> to vector<8x8xf32>
    %c0_27 = arith.constant 0 : index
    %c16 = arith.constant 16 : index
    %74 = vector.load %arg8[%c0_27, %c16] : memref<8x32xf32, #tpu.memory_space<vmem>>, vector<8x8xf32>
    tpu.vector_store %arg8[%c0_27, %c16], %73 {strides = array<i32>} : memref<8x32xf32, #tpu.memory_space<vmem>>, vector<8x8xf32>,
    %75 = vector.extract_strided_slice %5 {offsets = [0, 24], sizes = [8, 8], strides = [1, 1]} : vector<8x96xf32> to vector<8x8xf32>
    %76 = vector.shape_cast %75 : vector<8x8xf32> to vector<1x8x8xf32>
    %77 = vector.extract_strided_slice %5 {offsets = [0, 56], sizes = [8, 8], strides = [1, 1]} : vector<8x96xf32> to vector<8x8xf32>
    %78 = vector.shape_cast %77 : vector<8x8xf32> to vector<1x8x8xf32>
    %79 = vector.extract_strided_slice %5 {offsets = [0, 88], sizes = [8, 8], strides = [1, 1]} : vector<8x96xf32> to vector<8x8xf32>
    %80 = vector.shape_cast %79 : vector<8x8xf32> to vector<1x8x8xf32>
    "tpu.trace_start"() <{level = 10 : i32, message = "bqd,bkd->bqk"}> : () -> ()
    %cst_28 = arith.constant dense<0.000000e+00> : vector<1x8x8xf32>
    %81 = tpu.matmul %76, %78, %cst_28 {dimension_numbers = #tpu.dot_dimension_numbers<[2], [2], [1], [1], [0, 0, 0, 1, 1, 1], [0], [0]>} : vector<1x8x8xf32>, vector<1x8x8xf32>, vector<1x8x8xf32> -> vector<1x8x8xf32>
    %cst_29 = arith.constant -1.000000e+09 : f32
    "tpu.trace_stop"() : () -> ()
    %82 = vector.broadcast %cst_29 : f32 to vector<1x8x8xf32>
    %83 = arith.select %8, %81, %82 : vector<1x8x8xi1>, vector<1x8x8xf32>
    %cst_30 = arith.constant dense<0xFF800000> : vector<1x8xf32>
    %84 = vector.multi_reduction <maximumf>, %83, %cst_30 [2] : vector<1x8x8xf32> to vector<1x8xf32>
    %85 = vector.shape_cast %84 : vector<1x8xf32> to vector<1x8x1xf32>
    %86 = vector.broadcast %85 : vector<1x8x1xf32> to vector<1x8x8xf32>
    %87 = arith.subf %83, %86 : vector<1x8x8xf32>
    %88 = math.exp %87 : vector<1x8x8xf32>
    %cst_31 = arith.constant dense<0.000000e+00> : vector<1x8xf32>
    %89 = vector.multi_reduction <add>, %88, %cst_31 [2] : vector<1x8x8xf32> to vector<1x8xf32>
    %90 = vector.shape_cast %89 : vector<1x8xf32> to vector<1x8x1xf32>
    %91 = tpu.reciprocal %90 {approx = true} : vector<1x8x1xf32> -> vector<1x8x1xf32>
    %92 = vector.broadcast %91 : vector<1x8x1xf32> to vector<1x8x8xf32>
    %93 = arith.mulf %88, %92 : vector<1x8x8xf32>
    "tpu.trace_start"() <{level = 10 : i32, message = "bqk,bkd->bqd"}> : () -> ()
    %cst_32 = arith.constant dense<0.000000e+00> : vector<1x8x8xf32>
    %94 = tpu.matmul %93, %80, %cst_32 {dimension_numbers = #tpu.dot_dimension_numbers<[2], [1], [1], [2], [0, 0, 0, 1, 1, 2], [0], [0]>} : vector<1x8x8xf32>, vector<1x8x8xf32>, vector<1x8x8xf32> -> vector<1x8x8xf32>
    "tpu.trace_stop"() : () -> ()
    %95 = vector.shape_cast %94 : vector<1x8x8xf32> to vector<8x8xf32>
    %c0_33 = arith.constant 0 : index
    %c24 = arith.constant 24 : index
    %96 = vector.load %arg8[%c0_33, %c24] : memref<8x32xf32, #tpu.memory_space<vmem>>, vector<8x8xf32>
    tpu.vector_store %arg8[%c0_33, %c24], %95 {strides = array<i32>} : memref<8x32xf32, #tpu.memory_space<vmem>>, vector<8x8xf32>,
    %c0_34 = arith.constant 0 : index
    %c0_35 = arith.constant 0 : index
    %97 = vector.load %arg8[%c0_34, %c0_35] : memref<8x32xf32, #tpu.memory_space<vmem>>, vector<8x32xf32>
    %c0_36 = arith.constant 0 : index
    %c0_37 = arith.constant 0 : index
    %98 = vector.load %arg5[%c0_36, %c0_37] : memref<32x32xf32, #tpu.memory_space<vmem>>, vector<32x32xf32>
    %cst_38 = arith.constant dense<0.000000e+00> : vector<8x32xf32>
    %99 = tpu.matmul %97, %98, %cst_38 {dimension_numbers = #tpu.dot_dimension_numbers<[1], [0], [0], [1], [0, 0, 1, 1], [], []>} : vector<8x32xf32>, vector<32x32xf32>, vector<8x32xf32> -> vector<8x32xf32>
    %c0_39 = arith.constant 0 : index
    %c0_40 = arith.constant 0 : index
    %100 = vector.load %arg6[%c0_39, %c0_40] : memref<1x32xf32, #tpu.memory_space<vmem>>, vector<1x32xf32>
    %101 = vector.broadcast %100 : vector<1x32xf32> to vector<8x32xf32>
    %102 = arith.addf %99, %101 : vector<8x32xf32>
    %c0_41 = arith.constant 0 : index
    %c0_42 = arith.constant 0 : index
    %103 = vector.load %arg7[%c0_41, %c0_42] : memref<8x32xf32, #tpu.memory_space<vmem>>, vector<8x32xf32>
    tpu.vector_store %arg7[%c0_41, %c0_42], %102 {strides = array<i32>} : memref<8x32xf32, #tpu.memory_space<vmem>>, vector<8x32xf32>,
    return
  }
  func.func @transform_0(%arg0: i32) -> (i32, i32) {
    %c0_i32 = arith.constant 0 : i32
    %c0_i32_0 = arith.constant 0 : i32
    return %arg0, %c0_i32 : i32, i32
  }
  func.func @transform_1(%arg0: i32) -> (i32, i32, i32) {
    %c0_i32 = arith.constant 0 : i32
    %c0_i32_0 = arith.constant 0 : i32
    %c0_i32_1 = arith.constant 0 : i32
    return %arg0, %c0_i32, %c0_i32_0 : i32, i32, i32
  }
  func.func @transform_2(%arg0: i32) -> (i32, i32) {
    %c0_i32 = arith.constant 0 : i32
    %c0_i32_0 = arith.constant 0 : i32
    %c0_i32_1 = arith.constant 0 : i32
    return %c0_i32, %c0_i32_0 : i32, i32
  }
  func.func @transform_3(%arg0: i32) -> (i32, i32) {
    %c0_i32 = arith.constant 0 : i32
    %c0_i32_0 = arith.constant 0 : i32
    %c0_i32_1 = arith.constant 0 : i32
    return %c0_i32, %c0_i32_0 : i32, i32
  }
  func.func @transform_4(%arg0: i32) -> (i32, i32) {
    %c0_i32 = arith.constant 0 : i32
    %c0_i32_0 = arith.constant 0 : i32
    %c0_i32_1 = arith.constant 0 : i32
    return %c0_i32, %c0_i32_0 : i32, i32
  }
  func.func @transform_5(%arg0: i32) -> (i32, i32) {
    %c0_i32 = arith.constant 0 : i32
    %c0_i32_0 = arith.constant 0 : i32
    %c0_i32_1 = arith.constant 0 : i32
    return %c0_i32, %c0_i32_0 : i32, i32
  }
  func.func @transform_6(%arg0: i32) -> (i32, i32) {
    %c0_i32 = arith.constant 0 : i32
    %c0_i32_0 = arith.constant 0 : i32
    return %arg0, %c0_i32 : i32, i32
  }
}

</mosaic_0001>

<bundles_post_ra>
// kernel: tpu_custom_call.1
= control target key start
LH: loop header
LB: loop body
LE: loop exit
PB: predicated region body
PF: predicated region fallthrough
CT: control target
= control target key end

     0   :  { %s2123_s0 = inlined_call_operand.hbm [shape: f32[16,32], index: 0, kind: input, shape index: {}]   ;;  %s2124_s1 = inlined_call_operand.hbm [shape: bf16[2,8,8], index: 1, kind: input, shape index: {}]   ;;  %s2125_s2 = inlined_call_operand.hbm [shape: f32[32,96], index: 2, kind: input, shape index: {}]   ;;  %s2126_s3 = inlined_call_operand.vmem [shape: f32[1,96], index: 3, kind: input, shape index: {}]   ;;  %s2127_s4 = inlined_call_operand.hbm [shape: f32[32,32], index: 4, kind: input, shape index: {}]   ;;  %s2128_s5 = inlined_call_operand.vmem [shape: f32[1,32], index: 5, kind: input, shape index: {}]   ;;  %s2129_s6 = inlined_call_operand.hbm [shape: f32[16,32], index: 6, kind: output, shape index: {}]  }
   0x1   :  { %2134 = sst [smem:[#allocation17_spill]] %s2123_s0 }
   0x2   :  { %2135 = sst [smem:[#allocation18_spill]] %s2125_s2 }
   0x3   :  { %11 = vsyncpa [#allocation4], 0 }
   0x4   :  { %13 = vsyncpa [#allocation4 + $0x1], 0 }
   0x5   :  { %14 = vsyncpa [#allocation7], 0 }
   0x6   :  { %16 = vsyncpa [#allocation7 + $0x1], 0 }
   0x7   :  { %17 = vsyncpa [#allocation10], 0 }
   0x8   :  { %18 = vsyncpa [#allocation5], 0 }
   0x9   :  { %20 = vsyncpa [#allocation5 + $0x1], 0  ;;  %s1797_s21 = smov 0   ;;  %s1799_s22 = smov 0  }
   0xa   :  { %s1801_s23 = smov 0   ;;  %s1803_s24 = smov 0  }
   0xb LB: > { %s1818_s25 = sadd.s32 4294967295, %s1736_s24   ;;  %s1322_s26 = sadd.s32 4294967294, %s1736_s24   ;;  %s1736_s24 = sphi %s1803_s24, %s2161_s24   ;;  %s1732_s23 = sphi %s1801_s23, %s2160_s23   ;;  %s1728_s22 = sphi %s1799_s22, %s2159_s22   ;;  %s1724_s21 = sphi %s1797_s21, %s2158_s21  }
   0xc   : > { %p46_p0 = scmp.ne.s32.totalorder %s1728_s22, %s1724_s21  ;;  %p2130_p1 = scmp.eq.s32.totalorder %s1818_s25, 0 }
   0xd   : > { %p186_p3 = scmp.eq.s32.totalorder %s1322_s26, 1  ;;  %p1323_p5 = scmp.ge.s32.totalorder %s1736_s24, 1 }
   0xe   : > { %p1827_p4 = por %p2130_p1, %p46_p0  ;;  %p193_p7 = scmp.lt.s32.totalorder %s1736_s24, 3 }
   0xf   : > { %p1832_p6 = por %p186_p3, %p46_p0  ;;  %s1738_s30 = smov [#allocation8]  }
  0x10   : > { %s2136_s27 = scalar_select %p1827_p4, 1, 0 }
  0x11   : > { %s2137_s28 = scalar_select %p1832_p6, 1, 0 }
  0x12   : > { %p1837_p8 = pnand %p1323_p5, %p193_p7  ;;  %s205_s7 = sshll.u32 %s1738_s30, 4  ;;  %s206_s7 = int_to_ptr.vmem [resolvable:$true] %s205_s7 }
  0x13   : > { %s1739_s9 = smov [#allocation9]   ;;  %s1563_s11 = scalar_lea.vmem %s206_s7, 512 }
  0x14   : > { %s2138_s29 = scalar_select %p1837_p8, 1, 0 }
  0x15   : > { %p1459_p9 = pneg %p1837_p8  ;;  %s221_s10 = sshll.u32 %s1739_s9, 4  ;;  %s222_s10 = int_to_ptr.vmem [resolvable:$true] %s221_s10 }
  0x16   : > { %p1564_p13 = scmp.ne.s32.totalorder %s206_s7, %s1563_s11  ;;  %p1571_p5 = scmp.lt.s32.totalorder %s206_s7, %s206_s7 }
  0x17   : > { %p1846_p11 = pnand %p1459_p9, %p2130_p1  ;;  %p1572_p7 = scmp.lt.s32.totalorder %s1563_s11, %s1563_s11 }
  0x19   : > { %p1554_p12 = pneg %p1846_p11  ;;  %p1573_p10 = por %p1572_p7, %p1571_p5 }
  0x1b   : > { %p1566_p0 = pnand %p1564_p13, %p1554_p12 }
  0x1d   : > { %p1567_p3 = pneg %p1566_p0 }
  0x1f   : > { %p1574_p9 = pnand %p1573_p10, %p1567_p3 }
  0x21   : > { %1577 = shalt.err (!%p1574_p9)
}
  0x22   : > { %s1740_s12 = smov 128   ;;  %s1741_s13 = smov 8  }
  0x23   : > { %s2140_s2 = sld [smem:[#allocation18_spill]]  ;;  %s1589_s16 = scalar_lea.vmem %s222_s10, 512 }
  0x24   : > { %p1590_p1 = scmp.ne.s32.totalorder %s222_s10, %s1589_s16  ;;  %p1597_p2 = scmp.lt.s32.totalorder %s222_s10, %s222_s10 }
  0x25   : > { %p1598_p6 = scmp.lt.s32.totalorder %s1589_s16, %s1589_s16 }
  0x26   : > { %p1592_p13 = pnand %p1590_p1, %p1554_p12 }
  0x27   : > { %p1599_p5 = por %p1598_p6, %p1597_p2 }
  0x28   : > { %p1593_p0 = pneg %p1592_p13 }
  0x29   : > { %1462 = dma.hbm_to_vmem [thread:$0]  (!%p1846_p11), %s2140_s2, 512, %s206_s7, [#allocation7], %s1740_s12, %s1740_s12, %s1741_s13  }
  0x2a   : > { %p1600_p10 = pnand %p1599_p5, %p1593_p0 }
  0x2c   : > { %1603 = shalt.err (!%p1600_p10)
}
  0x2d   : > { %1465 = dma.hbm_to_vmem [thread:$0]  (!%p1846_p11), %s2127_s4, 512, %s222_s10, [#allocation10], %s1740_s12, %s1740_s12, %s1741_s13  }
  0x2e   : > { %s1869_s19 = sadd.s32 1, %s1736_s24   ;;  %s33_s20 = sadd.s32 1, %s1732_s23 }
  0x2f   : > { %s30_s26 = ssub.s32 %s1736_s24, %s1869_s19  ;;  %p40_p1 = scmp.ne.s32.totalorder %s1732_s23, %s1728_s22 }
  0x30   : > { %p31_p2 = scmp.eq.s32.totalorder %s30_s26, 0  ;;  %p41_p6 = scmp.eq.s32.totalorder %s1736_s24, 0 }
  0x31   : > { %p2141_p12 = scmp.eq.s32.totalorder %s1818_s25, 1  ;;  %p1479_p7 = scmp.lt.s32.totalorder %s1736_s24, 2 }
  0x32   : > { %s1885_s7 = scalar_select %p31_p2, %s1732_s23, %s33_s20  }
  0x33   : > { %p1879_p3 = por %p2141_p12, %p40_p1  ;;  %p42_p9 = por %p41_p6, %p40_p1 }
  0x34   : > { %s1888_s8 = sand.u32 1, %s1732_s23   ;;  %s1328_s10 = sshll.u32 %s1736_s24, 7 }
  0x35   : > { %s2142_s30 = scalar_select %p1879_p3, 1, 0 }
  0x36   : > { %s1327_s9 = sshll.u32 %s1888_s8, 3  ;;  %s2143_s0 = sld [smem:[#allocation17_spill]] }
  0x37   : > { %s242_s14 = scalar_lea.vmem [#allocation3], %s1327_s9  ;;  %p1899_p11 = pnand %p1479_p7, %p42_p9 }
  0x38   : > { %s249_s15 = sshll.u32 %s242_s14, 4  ;;  %s239_s20 = scalar_lea.sflag [#allocation4], %s1888_s8  ;;  %s1897_s15 = int_to_ptr.vmem [resolvable:$true] %s249_s15 }
  0x39   : > { %p1606_p0 = pneg %p1899_p11 }
  0x3c   : > { %s1895_s13 = scalar_lea.hbm %s2143_s0, %s1328_s10  ;;  %s1609_s11 = scalar_lea.hbm %s2143_s0, 256 }
  0x3d   : > { %s1604_s26 = scalar_lea.hbm %s1895_s13, 128  ;;  %p1610_p1 = scmp.lt.s32.totalorder %s1895_s13, %s2143_s0 }
  0x3e   : > { %p1605_p13 = scmp.ne.s32.totalorder %s1895_s13, %s1604_s26  ;;  %p1611_p2 = scmp.lt.s32.totalorder %s1609_s11, %s1604_s26 }
  0x40   : > { %p1607_p5 = pnand %p1606_p0, %p1605_p13  ;;  %p1612_p6 = por %p1611_p2, %p1610_p1 }
  0x42   : > { %p1608_p10 = pneg %p1607_p5 }
  0x44   : > { %p1613_p12 = pnand %p1612_p6, %p1608_p10 }
  0x46   : > { %1616 = shalt.err (!%p1613_p12)
}
  0x47   : > { %s1617_s17 = scalar_lea.vmem %s1897_s15, 128  ;;  %s1742_s9 = smov [#allocation3]  }
  0x48   : > { %p1618_p7 = scmp.ne.s32.totalorder %s1897_s15, %s1617_s17  ;;  %s1622_s10 = sshll.u32 %s1742_s9, 4  ;;  %s1623_s10 = int_to_ptr.vmem [resolvable:$false] %s1622_s10 }
  0x49   : > { %s1624_s18 = scalar_lea.vmem %s1623_s10, 256  ;;  %p1625_p5 = scmp.lt.s32.totalorder %s1897_s15, %s1623_s10 }
  0x4a   : > { %p1620_p9 = pnand %p1618_p7, %p1606_p0  ;;  %p1626_p3 = scmp.lt.s32.totalorder %s1624_s18, %s1617_s17 }
  0x4c   : > { %p1621_p13 = pneg %p1620_p9  ;;  %p1627_p4 = por %p1626_p3, %p1625_p5 }
  0x4e   : > { %p1628_p1 = pnand %p1627_p4, %p1621_p13 }
  0x50   : > { %1631 = shalt.err (!%p1628_p1)
}
  0x51   : > { %1469 = dma.hbm_to_vmem [thread:$0]  (!%p1899_p11), %s1895_s13, 128, %s1897_s15, %s239_s20  }
  0x52   : > { %s1330_s26 = sshll.u32 %s1736_s24, 6  ;;  %s2145_s9 = sshll.u32 %s1888_s8, 2 }
  0x53   : > { %s1934_s14 = scalar_lea.hbm %s2124_s1, %s1330_s26  ;;  %s260_s17 = scalar_lea.vmem [#allocation6], %s2145_s9 }
  0x54   : > { %s267_s18 = sshll.u32 %s260_s17, 4  ;;  %s2146_s10 = sand.u32 1, %s1736_s24   ;;  %s268_s18 = int_to_ptr.vmem [resolvable:$true] %s267_s18 }
  0x55   : > { %s257_s0 = scalar_lea.sflag [#allocation7], %s2146_s10  ;;  %s1632_s2 = scalar_lea.hbm %s1934_s14, 64 }
  0x56   : > { %p1633_p4 = scmp.ne.s32.totalorder %s1934_s14, %s1632_s2  ;;  %s1637_s20 = scalar_lea.hbm %s2124_s1, 128 }
  0x57   : > { %p1638_p2 = scmp.lt.s32.totalorder %s1934_s14, %s2124_s1  ;;  %p1639_p6 = scmp.lt.s32.totalorder %s1637_s20, %s1632_s2 }
  0x58   : > { %p1635_p3 = pnand %p1633_p4, %p1606_p0 }
  0x59   : > { %p1640_p12 = por %p1639_p6, %p1638_p2 }
  0x5a   : > { %p1636_p10 = pneg %p1635_p3 }
  0x5c   : > { %p1641_p7 = pnand %p1640_p12, %p1636_p10 }
  0x5e   : > { %1644 = shalt.err (!%p1641_p7)
}
  0x5f   : > { %s1645_s11 = scalar_lea.vmem %s268_s18, 64  ;;  %s1743_s12 = smov [#allocation6]  }
  0x60   : > { %p1646_p9 = scmp.ne.s32.totalorder %s268_s18, %s1645_s11  ;;  %s1650_s9 = sshll.u32 %s1743_s12, 4  ;;  %s1651_s9 = int_to_ptr.vmem [resolvable:$false] %s1650_s9 }
  0x61   : > { %s1652_s17 = scalar_lea.vmem %s1651_s9, 128  ;;  %p1653_p1 = scmp.lt.s32.totalorder %s268_s18, %s1651_s9 }
  0x62   : > { %p1648_p13 = pnand %p1646_p9, %p1606_p0  ;;  %p1654_p4 = scmp.lt.s32.totalorder %s1652_s17, %s1645_s11 }
  0x64   : > { %p1649_p5 = pneg %p1648_p13  ;;  %p1655_p3 = por %p1654_p4, %p1653_p1 }
  0x66   : > { %p1656_p8 = pnand %p1655_p3, %p1649_p5 }
  0x68   : > { %1659 = shalt.err (!%p1656_p8)
}
  0x69   : > { %1472 = dma.hbm_to_vmem [thread:$0]  (!%p1899_p11), %s1934_s14, 64, %s268_s18, %s257_s0  }
  0x6a   : > { %p2147_p10 = scmp.ne.s32.totalorder %s2138_s29, 0 }
  0x6b   : > { %s1961_s2 = sand.u32 (!%p2147_p10), 1, %s1728_s22   ;;  %p2148_p0 = scmp.ne.s32.totalorder (!%p2147_p10), %s2136_s27, 0 }
  0x6c   : > { %276 = sbr.rel (%p2147_p10) target bundleno = 2031 (0x7ef), region = 44  ;;  %s1332_s10 = sshll.u32 (!%p2147_p10), %s1961_s2, 3 }
  0x6d   : > { %s279_s13 = scalar_lea.sflag (!%p2147_p10), [#allocation4], %s1961_s2  ;;  %s282_s15 = scalar_lea.vmem (!%p2147_p10), [#allocation3], %s1332_s10 }
  0x71   : > { %1703 = dma.done.wait (%p2148_p0), %s279_s13, 128  }
  0x72   : > { %1705 = vsyncadd (%p2148_p0), %s279_s13, 4294967168  ;;  %s287_s0 = sand.u32 1, %s1818_s25   ;;  %s1333_s29 = sshll.u32 %s1961_s2, 2 }
  0x73   : > { %s288_s16 = scalar_lea.sflag [#allocation7], %s287_s0  ;;  %s1973_s14 = scalar_lea.vmem [#allocation6], %s1333_s29 }
  0x74   : > { %1707 = dma.done.wait (%p2148_p0), %s288_s16, 64  }
  0x75   : > { %1709 = vsyncadd (%p2148_p0), %s288_s16, 4294967232  ;;  %p2149_p8 = scmp.eq.s32.totalorder %s1818_s25, 0 }
  0x77   : > { %1711 = dma.done.wait (%p2149_p8), [#allocation7], 512   ;;  %p2150_p11 = pmov %p2149_p8 }
  0x78   : > { %p2151_p2 = pmov %p2149_p8 }
  0x79   : > { %1713 = vsyncadd (%p2150_p11), [#allocation7], 4294966784 }
  0x7a   : > { %1715 = dma.done.wait (%p2151_p2), [#allocation10], 512   ;;  %p2152_p6 = pmov %p2151_p2 }
  0x7b   : > { %v1744_v0 = vmov 0.0   ;;  %vm1745_vm0 = vmmov 0   ;;  %v340_v1 = vld [vmem:[#allocation8 + $0x18] sm:$0xff]  ;;  %v339_v2 = vld [vmem:[#allocation8 + $0x10] sm:$0xff]  ;;  %v338_v3 = vld [vmem:[#allocation8 + $0x8] sm:$0xff]  ;;  %vm348_vm1 = vcmask 261120  }
  0x7c   : > { %1717 = vsyncadd (%p2152_p6), [#allocation10], 4294966784  ;;  %1383 = vmatprep.subr.mxu0 %v1744_v0  ;;  %1391 = vmatprep.mubr.msk.f32.mxu0 %vm1745_vm0, %v1744_v0  ;;  %v337_v4 = vld [vmem:[#allocation8] sm:$0xff]  ;;  %v336_v5 = vld [vmem:[%s282_s15] sm:$0xff]  ;;  %s1746_s20 = smov 64   ;;  %s1747_s26 = smov 96  }
  0x7d   : > { %1394 = vmatprep.subr.mxu1 %v1744_v0  ;;  %1396 = vmatprep.mubr.msk.f32.mxu1 %vm1745_vm0, %v1744_v0  ;;  %v1337_v6 = vld [vmem:[%s2126_s3] ss:$0 sm:$0xff]  ;;  %s1748_s8 = smov 88   ;;  %s1749_s11 = smov 120   ;;  %vm427_vm2 = vcmask 64512   ;;  %v1751_v16 = vmov 0  }
  0x7e   : > { %1384 = vmatpush3.msra.mxu0 %v340_v1  ;;  %s1750_s12 = smov 80   ;;  %v422_v15 = vld [vmem:[%s1973_s14] sm:$0xf]  ;;  %s1752_s9 = smov 72   ;;  %vm764_vm5 = vcmask 130112   ;;  %vm936_vm6 = vcmask 195712  }
  0x7f   : > { %1385 = vmatprep.subr.mxu0 %v1744_v0  ;;  %vm423_vm3 = vcmp.ne.bf16.partialorder %v422_v15, 0  ;;  %s1753_s17 = smov 112   ;;  %s1754_s13 = smov 104   ;;  %v1112_v15 = vld [vmem:[#allocation9 + $0x8] sm:$0xff]  ;;  %vm1108_vm7 = vcmask 261312  }
  0x80   : > { %1386 = vmatpush3.msra.mxu0 %v339_v2  ;;  %v502_v17 = vsel %vm423_vm3, 65537, %v1751_v16  ;;  %s1755_s15 = smov 56   ;;  %s1756_s0 = smov 48  }
  0x81   : > { %1387 = vmatprep.subr.mxu0 %v1744_v0  ;;  %v503_v18 = vunpack.c.l.b16 %v502_v17  ;;  %s1757_s29 = smov 40   ;;  %v1111_v17 = vld [vmem:[#allocation9] sm:$0xff]  ;;  %s1758_s16 = smov 8  }
  0x82   : > { %1388 = vmatpush3.msra.mxu0 %v338_v3  ;;  %s1759_s14 = smov 16   ;;  %s1760_s27 = smov 24  }
  0x83   : > { %1389 = vmatprep.subr.mxu0 %v1744_v0  ;;  %vm2020_vm4 = vcmp.ne.s32.totalorder %v503_v18, 0  ;;  %p2155_p7 = scmp.ne.s32.totalorder %s2142_s30, 0 }
  0x84   : > { %1390 = vmatpush3.msra.mxu0 %v337_v4 }
  0x85   : > { %1392 = vmatmul.mubr.msk.f32.vlgmr.msra.gmra.mxu0 %vm348_vm1, %v336_v5  ;;  %1414 = vmatprep.subr.mxu0 %v1744_v0 }
  0x86   : > { %1416 = vmatprep.mubr.msk.f32.mxu0 %vm1745_vm0, %v1744_v0 }
 0x145   : > { %v418_v7 = vpop.f32.mrf.mxu0 }
 0x146   : > { %v2003_v8 = vadd.f32 %v1337_v6, %v418_v7 }
 0x147   : > { %v1393_v9 = vpop.f32.mrf.mxu0 }
 0x148   : > { %517 = vrot.lane.b32.xlu1 %v2003_v8, %s1746_s20  ;;  %425 = vrot.lane.b32.xlu0 %v2003_v8, %s1747_s26  ;;  %s1354_s26 = sshll.u32 %s1818_s25, 7  ;;  %s1761_s25 = smov [#allocation11]  }
 0x14c   : > { %596 = vrot.lane.b32.xlu1 %v2003_v8, %s1748_s8  ;;  %s332_s8 = scalar_lea.vmem [#allocation11], %s1332_s10  ;;  %s1664_s10 = sshll.u32 %s1761_s25, 4  ;;  %s1665_s10 = int_to_ptr.vmem [resolvable:$false] %s1664_s10 }
 0x150   : > { %594 = vrot.lane.b32.xlu1 %v2003_v8, %s1749_s11  ;;  %s1210_s11 = sshll.u32 %s332_s8, 4  ;;  %s1211_s11 = int_to_ptr.vmem [resolvable:$true] %s1210_s11 }
 0x151   : > { %p1667_p5 = scmp.lt.s32.totalorder %s1211_s11, %s1665_s10 }
 0x154   : > { %768 = vrot.lane.b32.xlu1 %v2003_v8, %s1750_s12 }
 0x1ba   : > { %v518_v10 = vpop.permute.xlu1 %517  ;;  %v426_v11 = vpop.permute.xlu0 %425 }
 0x1bb   : > { %1395 = vmatpush3.xpose.msk.msra.mxu1 %vm427_vm2, %v426_v11 }
 0x1bc   : > { %1399 = vmatprep.subr.mxu1 %v1744_v0 }
 0x1be   : > { %v597_v12 = vpop.permute.xlu1 %596  ;;  %1397 = vmatmul.mubr.msk.f32.vlgmr.msra.gmra.mxu1 %vm427_vm2, %v2003_v8 }
 0x1bf   : > { %1400 = vmatpush3.msra.mxu1 %v518_v10  ;;  %1401 = vmatprep.mubr.msk.f32.mxu1 %vm1745_vm0, %v1744_v0 }
 0x1c0   : > { %1404 = vmatprep.subr.mxu1 %v1744_v0 }
 0x1c2   : > { %v595_v13 = vpop.permute.xlu1 %594 }
 0x1c6   : > { %v769_v14 = vpop.permute.xlu1 %768 }
 0x1c7   : > { %1415 = vmatpush3.xpose.msk.msra.mxu0 %vm427_vm2, %v769_v14  ;;  %v1113_v14 = vld [vmem:[#allocation9 + $0x10] sm:$0xff] }
 0x1c8   : > { %1424 = vmatprep.subr.mxu0 %v1744_v0 }
 0x27e   : > { %v498_v20 = vpop.f32.mrf.mxu1 }
 0x27f   : > { %v505_v21 = vsel %vm2020_vm4, %v498_v20, -1e+09 }
 0x280   : > { %v1398_v22 = vpop.f32.mrf.mxu1  ;;  %v506_v23 = vsel %vm427_vm2, %v505_v21, -inf }
 0x281   : > { %507 = vmax.xlane.f32.xlu0 %v506_v23 }
 0x297   : > { %940 = vrot.lane.b32.xlu0 %v2003_v8, %s1752_s9 }
 0x30a   : > { %v508_v24 = vpop.xlane.xlu0 %507 }
 0x30b   : > { %v509_v25 = vsub.f32 %v505_v21, %v508_v24 }
 0x30d   : > { %v510_v26 = vmul.f32 1.442695, %v509_v25 }
 0x30e   : > { %v941_v31 = vpop.permute.xlu0 %940 }
 0x30f   : > { %1536 = vpow2.f32 %v510_v26  ;;  %v1351_v26 = vld [vmem:[%s2128_s5] ss:$0 sm:$0xff] }
 0x31c   : > { %v1537_v27 = vpop.eup %1536 }
 0x31d   : > { %v512_v28 = vsel %vm427_vm2, %v1537_v27, 0.0 }
 0x31e   : > { %513 = vadd.xlane.f32.xlu1 %v512_v28 }
 0x32f   : > { %766 = vrot.lane.b32.xlu1 %v2003_v8, %s1753_s17  ;;  %s2085_s17 = scalar_lea.hbm %s2129_s6, %s1354_s26 }
 0x333   : > { %938 = vrot.lane.b32.xlu1 %v2003_v8, %s1754_s13  ;;  %s1197_s13 = scalar_lea.sflag [#allocation5], %s1961_s2 }
 0x3a7   : > { %v514_v29 = vpop.xlane.xlu1 %513 }
 0x3a8   : > { %1538 = vrcp.f32 %v514_v29 }
 0x3ab   : > { %v767_v30 = vpop.permute.xlu1 %766 }
 0x3ac   : > { %1417 = vmatmul.mubr.msk.f32.vlgmr.msra.gmra.mxu0 %vm427_vm2, %v767_v30 }
 0x3ad   : > { %1425 = vmatpush3.xpose.msk.msra.mxu0 %vm427_vm2, %v941_v31  ;;  %1426 = vmatprep.mubr.msk.f32.mxu0 %vm1745_vm0, %v1744_v0 }
 0x3ae   : > { %1434 = vmatprep.subr.mxu0 %v1744_v0 }
 0x3af   : > { %v939_v32 = vpop.permute.xlu1 %938 }
 0x3b0   : > { %1427 = vmatmul.mubr.msk.f32.vlgmr.msra.gmra.mxu0 %vm427_vm2, %v939_v32 }
 0x3b1   : > { %1442 = vmatprep.mubr.msk.f32.mxu0 %vm1745_vm0, %v1744_v0 }
 0x3b5   : > { %v1539_v33 = vpop.eup %1538 }
 0x3b6   : > { %v516_v34 = vmul.f32 %v1539_v33, %v1537_v27 }
 0x3b8   : > { %1402 = vmatmul.mubr.msk.f32.vlgmr.msra.gmra.mxu1 %vm427_vm2, %v516_v34 }
 0x3b9   : > { %1405 = vmatpush3.xpose.msk.msra.mxu1 %vm427_vm2, %v597_v12  ;;  %1406 = vmatprep.mubr.msk.f32.mxu1 %vm1745_vm0, %v1744_v0 }
 0x3ba   : > { %1409 = vmatprep.subr.mxu1 %v1744_v0 }
 0x3bc   : > { %1407 = vmatmul.mubr.msk.f32.vlgmr.msra.gmra.mxu1 %vm427_vm2, %v595_v13  ;;  %v1114_v13 = vld [vmem:[#allocation9 + $0x18] sm:$0xff] }
 0x3bd   : > { %1411 = vmatprep.mubr.msk.f32.mxu1 %vm1745_vm0, %v1744_v0  ;;  %1435 = vmatpush3.msra.mxu0 %v1114_v13 }
 0x3be   : > { %1436 = vmatprep.subr.mxu0 %v1744_v0 }
 0x3bf   : > { %1437 = vmatpush3.msra.mxu0 %v1113_v14 }
 0x3c0   : > { %1438 = vmatprep.subr.mxu0 %v1744_v0 }
 0x3c1   : > { %1439 = vmatpush3.msra.mxu0 %v1112_v15 }
 0x3c2   : > { %1440 = vmatprep.subr.mxu0 %v1744_v0 }
 0x3c3   : > { %1441 = vmatpush3.msra.mxu0 %v1111_v17 }
 0x46c   : > { %v840_v35 = vpop.f32.mrf.mxu0 }
 0x46d   : > { %v844_v36 = vsel %vm2020_vm4, %v840_v35, -1e+09 }
 0x46e   : > { %v1418_v37 = vpop.f32.mrf.mxu0  ;;  %v845_v38 = vsel %vm427_vm2, %v844_v36, -inf }
 0x46f   : > { %846 = vmax.xlane.f32.xlu0 %v845_v38 }
 0x470   : > { %v1012_v39 = vpop.f32.mrf.mxu0 }
 0x471   : > { %v1016_v47 = vsel %vm2020_vm4, %v1012_v39, -1e+09 }
 0x472   : > { %v1428_v40 = vpop.f32.mrf.mxu0  ;;  %v1017_v48 = vsel %vm427_vm2, %v1016_v47, -inf }
 0x478   : > { %v589_v41 = vpop.f32.mrf.mxu1 }
 0x479   : > { %593 = vst.msk [vmem:[#allocation2] sm:$0xff] %vm427_vm2, %v589_v41 }
 0x47a   : > { %v1403_v42 = vpop.f32.mrf.mxu1 }
 0x47c   : > { %v668_v43 = vpop.f32.mrf.mxu1 }
 0x47d   : > { %v672_v44 = vsel %vm2020_vm4, %v668_v43, -1e+09 }
 0x47e   : > { %v1408_v45 = vpop.f32.mrf.mxu1  ;;  %v673_v46 = vsel %vm427_vm2, %v672_v44, -inf }
 0x47f   : > { %674 = vmax.xlane.f32.xlu1 %v673_v46 }
 0x483   : > { %1018 = vmax.xlane.f32.xlu1 %v1017_v48 }
 0x4f8   : > { %v847_v49 = vpop.xlane.xlu0 %846 }
 0x4f9   : > { %v848_v50 = vsub.f32 %v844_v36, %v847_v49 }
 0x4fb   : > { %v849_v51 = vmul.f32 1.442695, %v848_v50 }
 0x4fd   : > { %1540 = vpow2.f32 %v849_v51 }
 0x508   : > { %v675_v52 = vpop.xlane.xlu1 %674 }
 0x509   : > { %v676_v60 = vsub.f32 %v672_v44, %v675_v52 }
 0x50a   : > { %v1541_v53 = vpop.eup %1540 }
 0x50b   : > { %v851_v54 = vsel %vm427_vm2, %v1541_v53, 0.0  ;;  %v677_v61 = vmul.f32 1.442695, %v676_v60 }
 0x50c   : > { %852 = vadd.xlane.f32.xlu1 %v851_v54  ;;  %v1019_v55 = vpop.xlane.xlu1 %1018 }
 0x50d   : > { %v1020_v56 = vsub.f32 %v1016_v47, %v1019_v55 }
 0x50f   : > { %v1021_v57 = vmul.f32 1.442695, %v1020_v56 }
 0x511   : > { %1542 = vpow2.f32 %v1021_v57 }
 0x512   : > { %1544 = vpow2.f32 %v677_v61 }
 0x51d   : > { %684 = vrot.lane.b32.xlu1 %v2003_v8, %s1755_s15  ;;  %s1660_s15 = scalar_lea.vmem %s1211_s11, 128 }
 0x51e   : > { %v1543_v58 = vpop.eup %1542  ;;  %p1661_p12 = scmp.ne.s32.totalorder %s1211_s11, %s1660_s15 }
 0x51f   : > { %v1023_v59 = vsel %vm427_vm2, %v1543_v58, 0.0  ;;  %v1545_v62 = vpop.eup %1544 }
 0x520   : > { %1024 = vadd.xlane.f32.xlu0 %v1023_v59  ;;  %v679_v63 = vsel %vm427_vm2, %v1545_v62, 0.0  ;;  %p1662_p9 = pnand %p1661_p12, %p2155_p7 }
 0x522   : > { %p1663_p13 = pneg %p1662_p9 }
 0x536   : > { %856 = vrot.lane.b32.xlu0 %v2003_v8, %s1756_s0  ;;  %s1666_s0 = scalar_lea.vmem %s1665_s10, 256 }
 0x537   : > { %p1668_p1 = scmp.lt.s32.totalorder %s1666_s0, %s1660_s15 }
 0x539   : > { %p1669_p4 = por %p1668_p1, %p1667_p5 }
 0x53b   : > { %p1670_p3 = pnand %p1669_p4, %p1663_p13 }
 0x541   : > { %680 = vadd.xlane.f32.xlu1 %v679_v63 }
 0x552   : > { %1028 = vrot.lane.b32.xlu1 %v2003_v8, %s1757_s29 }
 0x595   : > { %v853_v1 = vpop.xlane.xlu1 %852 }
 0x599   : > { %v685_v2 = vpop.permute.xlu1 %684 }
 0x59a   : > { %1410 = vmatpush3.msra.mxu1 %v685_v2 }
 0x59b   : > { %1419 = vmatprep.subr.mxu1 %v1744_v0 }
 0x5a9   : > { %v1025_v4 = vpop.xlane.xlu0 %1024 }
 0x5ad   : > { %v857_v9 = vpop.permute.xlu0 %856 }
 0x5ca   : > { %v681_v3 = vpop.xlane.xlu1 %680 }
 0x5cb   : > { %1546 = vrcp.f32 %v681_v3 }
 0x5cc   : > { %1548 = vrcp.f32 %v853_v1 }
 0x5cd   : > { %1550 = vrcp.f32 %v1025_v4 }
 0x5ce   : > { %v1029_v11 = vpop.permute.xlu1 %1028 }
 0x5d8   : > { %v1547_v5 = vpop.eup %1546 }
 0x5d9   : > { %v683_v6 = vmul.f32 %v1547_v5, %v1545_v62  ;;  %v1549_v7 = vpop.eup %1548 }
 0x5da   : > { %v855_v8 = vmul.f32 %v1549_v7, %v1541_v53  ;;  %v1551_v10 = vpop.eup %1550 }
 0x5db   : > { %1412 = vmatmul.mubr.msk.f32.vlgmr.msra.gmra.mxu1 %vm427_vm2, %v683_v6  ;;  %v1027_v12 = vmul.f32 %v1551_v10, %v1543_v58 }
 0x5dc   : > { %1420 = vmatpush3.msra.mxu1 %v857_v9  ;;  %1421 = vmatprep.mubr.msk.f32.mxu1 %vm1745_vm0, %v1744_v0 }
 0x5dd   : > { %1429 = vmatprep.subr.mxu1 %v1744_v0 }
 0x5df   : > { %1422 = vmatmul.mubr.msk.f32.vlgmr.msra.gmra.mxu1 %vm427_vm2, %v855_v8 }
 0x5e0   : > { %1430 = vmatpush3.msra.mxu1 %v1029_v11  ;;  %1431 = vmatprep.mubr.msk.f32.mxu1 %vm1745_vm0, %v1744_v0 }
 0x5e3   : > { %1432 = vmatmul.mubr.msk.f32.vlgmr.msra.gmra.mxu1 %vm427_vm2, %v1027_v12 }
 0x69b   : > { %v756_v16 = vpop.f32.mrf.mxu1 }
 0x69c   : > { %761 = vrot.lane.b32.xlu1 %v756_v16, %s1758_s16 }
 0x69d   : > { %v1413_v18 = vpop.f32.mrf.mxu1 }
 0x69f   : > { %v928_v19 = vpop.f32.mrf.mxu1 }
 0x6a0   : > { %933 = vrot.lane.b32.xlu0 %v928_v19, %s1759_s14 }
 0x6a1   : > { %v1423_v20 = vpop.f32.mrf.mxu1 }
 0x6a3   : > { %v1100_v21 = vpop.f32.mrf.mxu1 }
 0x6a4   : > { %1105 = vrot.lane.b32.xlu1 %v1100_v21, %s1760_s27 }
 0x6a5   : > { %v1433_v22 = vpop.f32.mrf.mxu1 }
 0x70e   : > { %v762_v23 = vpop.permute.xlu1 %761 }
 0x70f   : > { %765 = vst.msk [vmem:[#allocation2] sm:$0xff] %vm764_vm5, %v762_v23 }
 0x712   : > { %v934_v24 = vpop.permute.xlu0 %933 }
 0x713   : > { %937 = vst.msk [vmem:[#allocation2] sm:$0xff] %vm936_vm6, %v934_v24 }
 0x716   : > { %v1106_v0 = vpop.permute.xlu1 %1105 }
 0x717   : > { %1109 = vst.msk [vmem:[#allocation2] sm:$0xff] %vm1108_vm7, %v1106_v0 }
 0x71e   : > { %v1110_v25 = vld [vmem:[#allocation2] sm:$0xff] }
 0x71f   : > { %1443 = vmatmul.mubr.msk.f32.vlgmr.msra.gmra.mxu0 %vm348_vm1, %v1110_v25 }
 0x7df   : > { %v1191_v27 = vpop.f32.mrf.mxu0 }
 0x7e0   : > { %v1192_v28 = vadd.f32 %v1351_v26, %v1191_v27 }
 0x7e1   : > { %v1444_v29 = vpop.f32.mrf.mxu0 }
 0x7e2   : > { %1195 = vst.msk [vmem:[%s332_s8] sm:$0xff] %vm348_vm1, %v1192_v28 }
 0x7e3   : > { %1673 = shalt.err (!%p1670_p3)
}
 0x7e4   : > { %s1674_s29 = scalar_lea.hbm %s2085_s17, 128  ;;  %s1678_s14 = scalar_lea.hbm %s2129_s6, 256 }
 0x7e5   : > { %p1675_p10 = scmp.ne.s32.totalorder %s2085_s17, %s1674_s29  ;;  %p1679_p11 = scmp.lt.s32.totalorder %s2085_s17, %s2129_s6 }
 0x7e6   : > { %p1680_p2 = scmp.lt.s32.totalorder %s1678_s14, %s1674_s29 }
 0x7e7   : > { %p1676_p0 = pnand %p1675_p10, %p2155_p7 }
 0x7e8   : > { %p1681_p6 = por %p1680_p2, %p1679_p11 }
 0x7e9   : > { %p1677_p8 = pneg %p1676_p0 }
 0x7eb   : > { %p1682_p12 = pnand %p1681_p6, %p1677_p8 }
 0x7ed   : > { %1685 = shalt.err (!%p1682_p12)
}
 0x7ee   : > { %1457 = dma.vmem_to_hbm [thread:$0]  (%p2155_p7), %s1211_s11, 128, %s2085_s17, %s1197_s13  }
 0x7ef PF: > { %s1222_s20 = sand.u32 1, %s1724_s21   ;;  %p2156_p9 = scmp.ne.s32.totalorder %s2137_s28, 0 }
 0x7f0   : > { %p2157_p13 = scmp.ge.s32.totalorder %s1736_s24, 2  ;;  %s1223_s26 = scalar_lea.sflag [#allocation5], %s1222_s20 }
 0x7f2   : > { %p1474_p5 = pnand %p2157_p13, %p2156_p9 }
 0x7f4   : > { %p1475_p1 = pneg %p1474_p5 }
 0x7f6   : > { %1719 = dma.done.wait (%p1475_p1), %s1223_s26, 128  }
 0x7f7   : > { %1721 = vsyncadd (%p1475_p1), %s1223_s26, 4294967168  ;;  %p23_p4 = scmp.ge.s32.totalorder %s1869_s19, 4   ;;  %s2158_s21 = smov %s1728_s22 }
 0x7f8   : > { %s2159_s22 = smov %s1732_s23  ;;  %s2160_s23 = smov %s1885_s7 }
 0x7f9   : > { %s2161_s24 = smov %s1869_s19  ;;  %25 = sbr.rel (!%p23_p4) target bundleno = 11 (0xb), region = 110 }
 0x7fe   :  { %1228 = vsyncpa [#allocation4], 1 }
 0x7ff   :  { %1230 = vsyncpa [#allocation4 + $0x1], 1 }
 0x800   :  { %1231 = vsyncpa [#allocation7], 1 }
 0x801   :  { %1233 = vsyncpa [#allocation7 + $0x1], 1 }
 0x802   :  { %1234 = vsyncpa [#allocation10], 1 }
 0x803   :  { %1235 = vsyncpa [#allocation5], 1 }
 0x804   :  { %1237 = vsyncpa [#allocation5 + $0x1], 1 }

</bundles_post_ra>
